<compile_context>
chip_gen: v5e
topology: v5e:2x2
jax: 0.10.0
libtpu: 0.0.40
codegen_flags: <defaults>
</compile_context>

<pallas_src>
import jax
import jax.numpy as jnp
from jax.experimental import pallas as pl
from jax.experimental.pallas import tpu as pltpu

C_IN = 768
KD, KH, KW = 2, 3, 3
SD, SH, SW = 2, 3, 3
TEMPORAL_EMBED_DIM = 128  # temporal_embed_dim (chosen MXU-lane aligned)

# Tile sizes.  tm=256 / tk=2304 keeps (double-buffered) VMEM use ~5 MiB, well under
# the 32 MiB default scoped limit and v7x's 64 MiB physical VMEM, while staying at
# the big-block HBM-roofline sweet spot.  (On v5e a larger tk, e.g. 4608, also works.)
TM_DEFAULT = 256
TK_DEFAULT = 2304  # 18 * 128; divides K = 768*18 = 13824 exactly


def _round_up(x, m):
    return (x + m - 1) // m * m


def _matmul_kernel(a_ref, b_ref, o_ref):
    """o[i, :] (+)= a[i, k] @ b[k, :]; f32 accumulation directly in the output tile."""
    @pl.when(pl.program_id(1) == 0)
    def _():
        o_ref[...] = jnp.zeros_like(o_ref)

    o_ref[...] += jnp.dot(
        a_ref[...], b_ref[...], preferred_element_type=jnp.float32
    )


def _patch_matmul(patches, w_flat):
    """patches: (M, K) bf16, w_flat: (K, C_out) bf16 -> (M, C_out) f32 via Pallas."""
    M, K = patches.shape
    _, C_out = w_flat.shape

    tk = TK_DEFAULT if K % TK_DEFAULT == 0 else K
    tm = min(TM_DEFAULT, _round_up(M, 8))
    Mp = _round_up(M, tm)
    if Mp != M:
        # Zero rows contribute nothing; sliced off below.
        patches = jnp.pad(patches, ((0, Mp - M), (0, 0)))

    out = pl.pallas_call(
        _matmul_kernel,
        out_shape=jax.ShapeDtypeStruct((Mp, C_out), jnp.float32),
        grid_spec=pltpu.PrefetchScalarGridSpec(
            num_scalar_prefetch=0,
            grid=(Mp // tm, K // tk),                      # M first (parallel), K last (reduction)
            in_specs=[
                pl.BlockSpec((tm, tk), lambda i, k: (i, k)),
                pl.BlockSpec((tk, C_out), lambda i, k: (k, 0)),
            ],
            out_specs=pl.BlockSpec((tm, C_out), lambda i, k: (i, 0)),
        ),
        compiler_params=pltpu.CompilerParams(
            dimension_semantics=("parallel", "arbitrary"),
            vmem_limit_bytes=32 * 1024 * 1024,
        ),
        cost_estimate=pl.CostEstimate(
            flops=2 * Mp * K * C_out,
            transcendentals=0,
            bytes_accessed=Mp * K * 2 + K * C_out * 2 + Mp * C_out * 4,
        ),
    )(patches, w_flat)

    return out[:M]


def example_net_forward_ndhwc(x_cl, weight):
    """Channels-last fast path.

    x_cl: (N, D, H, W, C=768) ; weight: (C_out, 768, 2, 3, 3) PyTorch conv layout.
    Returns channels-last output (N, D//2, H//3, W//3, C_out).
    """
    N, D, H, W, C = x_cl.shape
    C_out = weight.shape[0]
    assert C == C_IN and D % SD == 0 and H % SH == 0 and W % SW == 0
    Do, Ho, Wo = D // SD, H // SH, W // SW

    # Patch extraction keeps C=768 as the (untouched) lane axis; only small
    # sublane-level axes move.  K ordering is (kd, kh, kw, c).
    xp = x_cl.reshape(N, Do, KD, Ho, KH, Wo, KW, C)
    xp = xp.transpose(0, 1, 3, 5, 2, 4, 6, 7)          # (N, Do, Ho, Wo, kd, kh, kw, C)
    patches = xp.reshape(N * Do * Ho * Wo, KD * KH * KW * C)

    # Absorb the K-ordering into a (cheap) weight permutation: (kd, kh, kw, c, C_out).
    w_flat = weight.transpose(2, 3, 4, 1, 0).reshape(KD * KH * KW * C, C_out)

    # bf16 inputs, f32 accumulation inside the kernel.
    out = _patch_matmul(patches.astype(jnp.bfloat16), w_flat.astype(jnp.bfloat16))
    return out.reshape(N, Do, Ho, Wo, C_out)


def example_net_forward(x, weight):
    """x: (N, 768, D, H, W) NCDHW ; weight: (C_out, 768, 2, 3, 3).

    Returns (N, C_out, D//2, H//3, W//3) NCDHW (matches nn.Conv3d, bias=False).
    # TODO(synk): if the caller can provide/consume channels-last tensors, use
    # example_net_forward_ndhwc directly and skip both relayouts below.
    """
    x_cl = jnp.transpose(x, (0, 2, 3, 4, 1))                       # NCDHW -> NDHWC
    out_cl = example_net_forward_ndhwc(x_cl, weight)               # (N, Do, Ho, Wo, C_out)
    return jnp.transpose(out_cl, (0, 4, 1, 2, 3))                  # -> NCDHW


if __name__ == "__main__":
    key = jax.random.PRNGKey(0)
    k_x, k_w = jax.random.split(key)

    # Small spatial shapes consistent with kernel/stride (2,3,3); C_in fixed at 768.
    N, D, H, W = 2, 2, 6, 6
    x = jax.random.normal(k_x, (N, C_IN, D, H, W), dtype=jnp.float32)

    # Deterministic kaiming-uniform-like init, std ~ 1/sqrt(fan_in); bias=False
    # (torchsparse Conv3d default).
    fan_in = C_IN * KD * KH * KW
    bound = 1.0 / jnp.sqrt(jnp.float32(fan_in))
    weight = jax.random.uniform(
        k_w, (TEMPORAL_EMBED_DIM, C_IN, KD, KH, KW),
        dtype=jnp.float32, minval=-bound, maxval=bound,
    )

    out = example_net_forward(x, weight)
    jax.block_until_ready(out)
    assert out.shape == (N, TEMPORAL_EMBED_DIM, D // SD, H // SH, W // SW)

    # Cross-check against plain-JAX 3D conv (same semantics as nn.Conv3d, bias=False).
    # Tolerance loosened vs the pure-f32 version because the kernel reads bf16 inputs
    # (f32 accumulation); expected error ~1e-2 at K=13824.
    ref = jax.lax.conv_general_dilated(
        x, weight, window_strides=(SD, SH, SW), padding="VALID",
        dimension_numbers=("NCDHW", "OIDHW", "NCDHW"),
    )
    assert jnp.allclose(out, ref, atol=2e-2, rtol=2e-2)

    print("KERNEL_OK")
</pallas_src>

<mosaic_0001>
module attributes {stable_mosaic.version = 11 : i64} {
  func.func @_matmul_kernel(%arg0: i32, %arg1: i32, %arg2: memref<8x2304xbf16, #tpu.memory_space<vmem>>, %arg3: memref<2304x128xbf16, #tpu.memory_space<vmem>>, %arg4: memref<8x128xf32, #tpu.memory_space<vmem>>) attributes {dimension_semantics = [#tpu.dimension_semantics<parallel>, #tpu.dimension_semantics<arbitrary>], iteration_bounds = array<i64: 1, 6>, scalar_prefetch = 0 : i64, scratch_operands = 0 : i64, tpu.core_type = #tpu.core_type<tc>, window_params = [{transform_indices = @transform_0, window_bounds = array<i64: 8, 2304>}, {transform_indices = @transform_1, window_bounds = array<i64: 2304, 128>}, {transform_indices = @transform_2, window_bounds = array<i64: 8, 128>}]} {
    %c0_i32 = arith.constant 0 : i32
    %0 = arith.cmpi eq, %arg1, %c0_i32 : i32
    %1 = arith.extui %0 : i1 to i32
    %c0_i32_0 = arith.constant 0 : i32
    %2 = arith.cmpi ne, %1, %c0_i32_0 : i32
    scf.if %2 {
      %cst_8 = arith.constant 0.000000e+00 : f32
      %9 = vector.broadcast %cst_8 : f32 to vector<8x128xf32>
      %c0_9 = arith.constant 0 : index
      %c0_10 = arith.constant 0 : index
      %10 = vector.load %arg4[%c0_9, %c0_10] : memref<8x128xf32, #tpu.memory_space<vmem>>, vector<8x128xf32>
      tpu.vector_store %arg4[%c0_9, %c0_10], %9 {strides = array<i32>} : memref<8x128xf32, #tpu.memory_space<vmem>>, vector<8x128xf32>,
    } else {
    }
    %c0 = arith.constant 0 : index
    %c0_1 = arith.constant 0 : index
    %3 = vector.load %arg4[%c0, %c0_1] : memref<8x128xf32, #tpu.memory_space<vmem>>, vector<8x128xf32>
    %c0_2 = arith.constant 0 : index
    %c0_3 = arith.constant 0 : index
    %4 = vector.load %arg2[%c0_2, %c0_3] : memref<8x2304xbf16, #tpu.memory_space<vmem>>, vector<8x2304xbf16>
    %c0_4 = arith.constant 0 : index
    %c0_5 = arith.constant 0 : index
    %5 = vector.load %arg3[%c0_4, %c0_5] : memref<2304x128xbf16, #tpu.memory_space<vmem>>, vector<2304x128xbf16>
    %cst = arith.constant dense<0.000000e+00> : vector<8x128xf32>
    %6 = tpu.matmul %4, %5, %cst {dimension_numbers = #tpu.dot_dimension_numbers<[1], [0], [0], [1], [0, 0, 1, 1], [], []>} : vector<8x2304xbf16>, vector<2304x128xbf16>, vector<8x128xf32> -> vector<8x128xf32>
    %7 = arith.addf %3, %6 : vector<8x128xf32>
    %c0_6 = arith.constant 0 : index
    %c0_7 = arith.constant 0 : index
    %8 = vector.load %arg4[%c0_6, %c0_7] : memref<8x128xf32, #tpu.memory_space<vmem>>, vector<8x128xf32>
    tpu.vector_store %arg4[%c0_6, %c0_7], %7 {strides = array<i32>} : memref<8x128xf32, #tpu.memory_space<vmem>>, vector<8x128xf32>,
    return
  }
  func.func @transform_0(%arg0: i32, %arg1: i32) -> (i32, i32) {
    %c0_i32 = arith.constant 0 : i32
    return %arg0, %arg1 : i32, i32
  }
  func.func @transform_1(%arg0: i32, %arg1: i32) -> (i32, i32) {
    %c0_i32 = arith.constant 0 : i32
    %c0_i32_0 = arith.constant 0 : i32
    return %arg1, %c0_i32 : i32, i32
  }
  func.func @transform_2(%arg0: i32, %arg1: i32) -> (i32, i32) {
    %c0_i32 = arith.constant 0 : i32
    %c0_i32_0 = arith.constant 0 : i32
    return %arg0, %c0_i32 : i32, i32
  }
}

</mosaic_0001>

<bundles_post_ra>
// kernel: tpu_custom_call.1
= control target key start
LH: loop header
LB: loop body
LE: loop exit
PB: predicated region body
PF: predicated region fallthrough
CT: control target
= control target key end

     0   :  { %7 = vsyncpa [#allocation3], 0  ;;  %s3017_s0 = inlined_call_operand.hbm [shape: bf16[8,13824], index: 0, kind: input, shape index: {}]   ;;  %s3018_s1 = inlined_call_operand.hbm [shape: bf16[13824,128], index: 1, kind: input, shape index: {}]   ;;  %s3019_s2 = inlined_call_operand.hbm [shape: f32[8,128], index: 2, kind: output, shape index: {}]  }
   0x1   :  { %9 = vsyncpa [#allocation3 + $0x1], 0 }
   0x2   :  { %10 = vsyncpa [#allocation6], 0 }
   0x3   :  { %12 = vsyncpa [#allocation6 + $0x1], 0 }
   0x4   :  { %13 = vsyncpa [#allocation4], 0  ;;  %s2753_s9 = smov 0   ;;  %s2755_s10 = smov 0  }
   0x5   :  { %s2757_s11 = smov 0   ;;  %s2759_s12 = smov 0  }
   0x6   :  { %s2761_s13 = smov 0   ;;  %s2763_s14 = smov 0  }
   0x7 LB: > { %s1779_s15 = sadd.s32 4294967295, %s2732_s14   ;;  %s28_s16 = sadd.s32 1, %s2728_s13  ;;  %s2732_s14 = sphi %s2763_s14, %s19_s14   ;;  %s2728_s13 = sphi %s2761_s13, %s3026_s13   ;;  %s2724_s12 = sphi %s2759_s12, %s3025_s12   ;;  %s2720_s11 = sphi %s2757_s11, %s3024_s11   ;;  %s2716_s10 = sphi %s2755_s10, %s3023_s10   ;;  %s2712_s9 = sphi %s2753_s9, %s3022_s9  }
   0x8   : > { %p29_p0 = scmp.ge.s32.totalorder %s28_s16, 6  ;;  %s40_s17 = sadd.s32 1, %s2720_s11 }
   0x9   : > { %p47_p1 = scmp.ne.s32.totalorder %s2720_s11, %s2716_s10  ;;  %p48_p2 = scmp.eq.s32.totalorder %s2732_s14, 0 }
   0xa   : > { %s3028_s16 = smov (%p29_p0, %s28_s16), 0  ;;  %p53_p4 = scmp.ne.s32.totalorder %s2716_s10, %s2712_s9 }
   0xb   : > { %p49_p3 = por %p48_p2, %p47_p1  ;;  %s36_s18 = ssub.s32 %s2728_s13, %s3028_s16 }
   0xc   : > { %p54_p5 = scmp.eq.s32.totalorder %s1779_s15, 0  ;;  %p38_p6 = scmp.eq.s32.totalorder %s36_s18, 0 }
   0xd   : > { %p2531_p8 = scmp.lt.s32.totalorder %s2732_s14, 6  ;;  %s2803_s21 = sand.u32 1, %s2720_s11  }
   0xe   : > { %p2794_p7 = por %p54_p5, %p53_p4  ;;  %s2366_s22 = smul.u32 72, %s2728_s13 }
   0xf   : > { %s2800_s20 = scalar_select %p38_p6, %s2720_s11, %s40_s17  }
  0x10   : > { %s2512_s23 = smul.u32 72, %s2803_s21  ;;  %s140_s26 = scalar_lea.hbm %s3017_s0, %s2366_s22 }
  0x11   : > { %p2810_p9 = pnand %p2531_p8, %p49_p3  ;;  %s142_s28 = sshll.u32 %s140_s26, 4  ;;  %s143_s28 = int_to_ptr.hbm [resolvable:$true] %s142_s28 }
  0x12   : > { %s133_s29 = scalar_lea.vmem [#allocation2], %s2512_s23  ;;  %s130_s3 = scalar_lea.sflag [#allocation3], %s2803_s21 }
  0x13   : > { %s144_s30 = sshll.u32 %s133_s29, 4  ;;  %p1784_p10 = scmp.ge.s32.totalorder %s2732_s14, 1  ;;  %s145_s30 = int_to_ptr.vmem [resolvable:$true] %s144_s30 }
  0x14   : > { %2527 = dma.hbm_to_vmem [thread:$0]  (!%p2810_p9), %s143_s28, 1152, %s145_s30, %s130_s3  }
  0x15   : > { %p171_p11 = scmp.lt.s32.totalorder %s2732_s14, 7  ;;  %s2513_s4 = smul.u32 1152, %s2803_s21 }
  0x16   : > { %s2367_s5 = smul.u32 1152, %s2728_s13  ;;  %s152_s22 = scalar_lea.sflag [#allocation6], %s2803_s21 }
  0x17   : > { %p172_p12 = pnand %p1784_p10, %p171_p11  ;;  %s155_s9 = scalar_lea.vmem [#allocation5], %s2513_s4 }
  0x18   : > { %s160_s8 = scalar_lea.hbm %s3018_s1, %s2367_s5  ;;  %s163_s17 = sshll.u32 %s155_s9, 4  ;;  %s164_s17 = int_to_ptr.vmem [resolvable:$true] %s163_s17 }
  0x19   : > { %s161_s18 = sshll.u32 %s160_s8, 4  ;;  %s2734_s23 = smov 64   ;;  %s162_s18 = int_to_ptr.hbm [resolvable:$true] %s161_s18 }
  0x1a   : > { %s2735_s24 = smov 4   ;;  %175 = sbr.rel (%p172_p12) target bundleno = 343 (0x157), region = 28 }
  0x1b   : > { %2530 = dma.hbm_to_vmem [thread:$0]  (!%p2810_p9), %s162_s18, 18432, %s164_s17, %s152_s22, %s2734_s23, %s2734_s23, %s2735_s24  }
  0x1c   : > { %s177_s25 = sand.u32 (!%p172_p12), 1, %s2716_s10  }
  0x1d   : > { %s2514_s26 = smul.u32 (!%p172_p12), 72, %s177_s25  ;;  %s178_s28 = scalar_lea.sflag (!%p172_p12), [#allocation3], %s177_s25 }
  0x1f   : > { %s2828_s29 = scalar_lea.vmem [#allocation2], %s2514_s26 }
  0x20   : > { %2699 = dma.done.wait (%p2794_p7), %s178_s28, 1152  }
  0x21   : > { %2701 = vsyncadd (%p2794_p7), %s178_s28, 4294966144  ;;  %s2515_s30 = smul.u32 1152, %s177_s25  ;;  %s188_s21 = scalar_lea.sflag [#allocation6], %s177_s25 }
  0x23   : > { %s2834_s3 = scalar_lea.vmem [#allocation5], %s2515_s30 }
  0x24   : > { %2703 = dma.done.wait (%p2794_p7), %s188_s21, 18432  }
  0x25   : > { %2705 = vsyncadd (%p2794_p7), %s188_s21, 4294948864  ;;  %p1785_p13 = scmp.ne.s32.totalorder %s2724_s12, 0 }
  0x27   : > { %218 = sbr.rel (%p1785_p13) target bundleno = 46 (0x2e), region = 40 }
  0x2c   : > { %v2736_v0 = vmov 0.0  }
  0x2d   : > { %219 = vst [vmem:[#allocation7] sm:$0xff] %v2736_v0 }
  0x2e PF: > { %v2375_v1 = vld [vmem:[%s2834_s3 + $0x38] sm:$0xff]  ;;  %v2374_v5 = vld [vmem:[%s2834_s3 + $0x30] sm:$0xff]  ;;  %v2373_v9 = vld [vmem:[%s2834_s3 + $0x28] sm:$0xff]  ;;  %s2737_s12 = smov [#allocation7]   ;;  %s1691_s5 = sshll.u32 %s3019_s2, 4  ;;  %s1692_s5 = int_to_ptr.hbm [resolvable:$true] %s1691_s5 }
  0x2f   : > { %v2383_v2 = vld [vmem:[%s2834_s3 + $0x78] sm:$0xff]  ;;  %1445 = vmatpush.bf16.msra.mxu0 %v2375_v1  ;;  %v2382_v6 = vld [vmem:[%s2834_s3 + $0x70] sm:$0xff]  ;;  %v2381_v10 = vld [vmem:[%s2834_s3 + $0x68] sm:$0xff]  ;;  %s1689_s19 = sshll.u32 %s2737_s12, 4  ;;  %p2532_p0 = scmp.eq.s32.totalorder %s1779_s15, 5  ;;  %s1690_s19 = int_to_ptr.vmem [resolvable:$true] %s1689_s19 }
  0x30   : > { %v2391_v3 = vld [vmem:[%s2834_s3 + $0xb8] sm:$0xff]  ;;  %1458 = vmatpush.bf16.msra.mxu1 %v2383_v2  ;;  %v2390_v7 = vld [vmem:[%s2834_s3 + $0xb0] sm:$0xff]  ;;  %v2389_v11 = vld [vmem:[%s2834_s3 + $0xa8] sm:$0xff] }
  0x31   : > { %v2399_v4 = vld [vmem:[%s2834_s3 + $0xf8] sm:$0xff]  ;;  %1471 = vmatpush.bf16.msra.mxu2 %v2391_v3  ;;  %v2398_v8 = vld [vmem:[%s2834_s3 + $0xf0] sm:$0xff]  ;;  %v2397_v12 = vld [vmem:[%s2834_s3 + $0xe8] sm:$0xff] }
  0x32   : > { %1484 = vmatpush.bf16.msra.mxu3 %v2399_v4  ;;  %v2372_v13 = vld [vmem:[%s2834_s3 + $0x20] sm:$0xff]  ;;  %v2371_v17 = vld [vmem:[%s2834_s3 + $0x18] sm:$0xff]  ;;  %v2370_v21 = vld [vmem:[%s2834_s3 + $0x10] sm:$0xff] }
  0x33   : > { %1446 = vmatpush.bf16.msra.mxu0 %v2374_v5  ;;  %v2380_v14 = vld [vmem:[%s2834_s3 + $0x60] sm:$0xff]  ;;  %v2379_v18 = vld [vmem:[%s2834_s3 + $0x58] sm:$0xff]  ;;  %v2378_v22 = vld [vmem:[%s2834_s3 + $0x50] sm:$0xff] }
  0x34   : > { %1459 = vmatpush.bf16.msra.mxu1 %v2382_v6  ;;  %v2388_v15 = vld [vmem:[%s2834_s3 + $0xa0] sm:$0xff]  ;;  %v2387_v19 = vld [vmem:[%s2834_s3 + $0x98] sm:$0xff]  ;;  %v2386_v23 = vld [vmem:[%s2834_s3 + $0x90] sm:$0xff] }
  0x35   : > { %1472 = vmatpush.bf16.msra.mxu2 %v2390_v7  ;;  %v2396_v16 = vld [vmem:[%s2834_s3 + $0xe0] sm:$0xff]  ;;  %v2395_v20 = vld [vmem:[%s2834_s3 + $0xd8] sm:$0xff]  ;;  %v2394_v24 = vld [vmem:[%s2834_s3 + $0xd0] sm:$0xff] }
  0x36   : > { %1485 = vmatpush.bf16.msra.mxu3 %v2398_v8  ;;  %v2369_v25 = vld [vmem:[%s2834_s3 + $0x8] sm:$0xff]  ;;  %v221_v27 = vld [vmem:[%s2828_s29] sm:$0xff]  ;;  %v222_v30 = vld [vmem:[%s2828_s29 + $0x8] sm:$0xff] }
  0x37   : > { %1447 = vmatpush.bf16.msra.mxu0 %v2373_v9  ;;  %v2377_v26 = vld [vmem:[%s2834_s3 + $0x48] sm:$0xff]  ;;  %v527_v31 = vunpack.c.l.b16 %v221_v27  ;;  %v2368_v32 = vld [vmem:[%s2834_s3] sm:$0xff]  ;;  %v529_v34 = vunpack.c.l.b16 %v222_v30  ;;  %v2407_v36 = vld [vmem:[%s2834_s3 + $0x138] sm:$0xff]  ;;  %v528_v37 = vunpack.c.h.b16 %v221_v27  ;;  %v530_v42 = vunpack.c.h.b16 %v222_v30 }
  0x38   : > { %1460 = vmatpush.bf16.msra.mxu1 %v2381_v10  ;;  %v2385_v28 = vld [vmem:[%s2834_s3 + $0x88] sm:$0xff]  ;;  %v2376_v33 = vld [vmem:[%s2834_s3 + $0x40] sm:$0xff]  ;;  %v2415_v38 = vld [vmem:[%s2834_s3 + $0x178] sm:$0xff] }
  0x39   : > { %1473 = vmatpush.bf16.msra.mxu2 %v2389_v11  ;;  %v2393_v29 = vld [vmem:[%s2834_s3 + $0xc8] sm:$0xff]  ;;  %v2384_v35 = vld [vmem:[%s2834_s3 + $0x80] sm:$0xff]  ;;  %v2423_v39 = vld [vmem:[%s2834_s3 + $0x1b8] sm:$0xff]  ;;  %v545_v41 = vpack.c.b16 %v527_v31, %v527_v31  ;;  %v547_v44 = vpack.c.b16 %v529_v34, %v529_v34  ;;  %v546_v46 = vpack.c.b16 %v528_v37, %v528_v37  ;;  %v548_v49 = vpack.c.b16 %v530_v42, %v530_v42 }
  0x3a   : > { %1486 = vmatpush.bf16.msra.mxu3 %v2397_v12  ;;  %v2392_v40 = vld [vmem:[%s2834_s3 + $0xc0] sm:$0xff]  ;;  %v2431_v43 = vld [vmem:[%s2834_s3 + $0x1f8] sm:$0xff]  ;;  %v2406_v45 = vld [vmem:[%s2834_s3 + $0x130] sm:$0xff] }
  0x3b   : > { %1448 = vmatpush.bf16.msra.mxu0 %v2372_v13  ;;  %v2414_v47 = vld [vmem:[%s2834_s3 + $0x170] sm:$0xff]  ;;  %v2405_v51 = vld [vmem:[%s2834_s3 + $0x128] sm:$0xff]  ;;  %v2404_v55 = vld [vmem:[%s2834_s3 + $0x120] sm:$0xff] }
  0x3c   : > { %1461 = vmatpush.bf16.msra.mxu1 %v2380_v14  ;;  %v2422_v48 = vld [vmem:[%s2834_s3 + $0x1b0] sm:$0xff]  ;;  %v2413_v52 = vld [vmem:[%s2834_s3 + $0x168] sm:$0xff]  ;;  %v2412_v56 = vld [vmem:[%s2834_s3 + $0x160] sm:$0xff] }
  0x3d   : > { %1474 = vmatpush.bf16.msra.mxu2 %v2388_v15  ;;  %v2430_v50 = vld [vmem:[%s2834_s3 + $0x1f0] sm:$0xff]  ;;  %v2421_v53 = vld [vmem:[%s2834_s3 + $0x1a8] sm:$0xff]  ;;  %v2420_v57 = vld [vmem:[%s2834_s3 + $0x1a0] sm:$0xff] }
  0x3e   : > { %1487 = vmatpush.bf16.msra.mxu3 %v2396_v16  ;;  %v2429_v54 = vld [vmem:[%s2834_s3 + $0x1e8] sm:$0xff]  ;;  %v2428_v58 = vld [vmem:[%s2834_s3 + $0x1e0] sm:$0xff]  ;;  %v2403_v59 = vld [vmem:[%s2834_s3 + $0x118] sm:$0xff] }
  0x3f   : > { %1449 = vmatpush.bf16.msra.mxu0 %v2371_v17  ;;  %v2411_v60 = vld [vmem:[%s2834_s3 + $0x158] sm:$0xff]  ;;  %v2402_v63 = vld [vmem:[%s2834_s3 + $0x110] sm:$0xff]  ;;  %v2401_v3 = vld [vmem:[%s2834_s3 + $0x108] sm:$0xff] }
  0x40   : > { %1462 = vmatpush.bf16.msra.mxu1 %v2379_v18  ;;  %v2419_v61 = vld [vmem:[%s2834_s3 + $0x198] sm:$0xff]  ;;  %v2410_v0 = vld [vmem:[%s2834_s3 + $0x150] sm:$0xff]  ;;  %v2409_v4 = vld [vmem:[%s2834_s3 + $0x148] sm:$0xff] }
  0x41   : > { %1475 = vmatpush.bf16.msra.mxu2 %v2387_v19  ;;  %v2427_v62 = vld [vmem:[%s2834_s3 + $0x1d8] sm:$0xff]  ;;  %v2418_v1 = vld [vmem:[%s2834_s3 + $0x190] sm:$0xff]  ;;  %v2417_v5 = vld [vmem:[%s2834_s3 + $0x188] sm:$0xff] }
  0x42   : > { %1488 = vmatpush.bf16.msra.mxu3 %v2395_v20  ;;  %v2426_v2 = vld [vmem:[%s2834_s3 + $0x1d0] sm:$0xff]  ;;  %v223_v7 = vld [vmem:[%s2828_s29 + $0x10] sm:$0xff]  ;;  %v2439_v15 = vld [vmem:[%s2834_s3 + $0x238] sm:$0xff] }
  0x43   : > { %1450 = vmatpush.bf16.msra.mxu0 %v2370_v21  ;;  %v224_v6 = vld [vmem:[%s2828_s29 + $0x18] sm:$0xff]  ;;  %v2400_v9 = vld [vmem:[%s2834_s3 + $0x100] sm:$0xff]  ;;  %v531_v13 = vunpack.c.l.b16 %v223_v7  ;;  %v532_v14 = vunpack.c.h.b16 %v223_v7  ;;  %v2447_v16 = vld [vmem:[%s2834_s3 + $0x278] sm:$0xff] }
  0x44   : > { %1463 = vmatpush.bf16.msra.mxu1 %v2378_v22  ;;  %v2425_v8 = vld [vmem:[%s2834_s3 + $0x1c8] sm:$0xff]  ;;  %v533_v10 = vunpack.c.l.b16 %v224_v6  ;;  %v2408_v11 = vld [vmem:[%s2834_s3 + $0x140] sm:$0xff]  ;;  %v2455_v17 = vld [vmem:[%s2834_s3 + $0x2b8] sm:$0xff]  ;;  %v534_v19 = vunpack.c.h.b16 %v224_v6 }
  0x45   : > { %1476 = vmatpush.bf16.msra.mxu2 %v2386_v23  ;;  %v2416_v12 = vld [vmem:[%s2834_s3 + $0x180] sm:$0xff]  ;;  %v2463_v20 = vld [vmem:[%s2834_s3 + $0x2f8] sm:$0xff]  ;;  %v549_v22 = vpack.c.b16 %v531_v13, %v531_v13  ;;  %v550_v23 = vpack.c.b16 %v532_v14, %v532_v14  ;;  %v2445_v30 = vld [vmem:[%s2834_s3 + $0x268] sm:$0xff] }
  0x46   : > { %1489 = vmatpush.bf16.msra.mxu3 %v2394_v24  ;;  %v2424_v18 = vld [vmem:[%s2834_s3 + $0x1c0] sm:$0xff]  ;;  %v551_v21 = vpack.c.b16 %v533_v10, %v533_v10  ;;  %v2438_v24 = vld [vmem:[%s2834_s3 + $0x230] sm:$0xff]  ;;  %v552_v27 = vpack.c.b16 %v534_v19, %v534_v19  ;;  %v2453_v31 = vld [vmem:[%s2834_s3 + $0x2a8] sm:$0xff] }
  0x47   : > { %1451 = vmatpush.bf16.msra.mxu0 %v2369_v25  ;;  %v2446_v25 = vld [vmem:[%s2834_s3 + $0x270] sm:$0xff]  ;;  %v2444_v34 = vld [vmem:[%s2834_s3 + $0x260] sm:$0xff]  ;;  %v2435_v37 = vld [vmem:[%s2834_s3 + $0x218] sm:$0xff] }
  0x48   : > { %1464 = vmatpush.bf16.msra.mxu1 %v2377_v26  ;;  %v2454_v26 = vld [vmem:[%s2834_s3 + $0x2b0] sm:$0xff]  ;;  %v2469_v7 = vld [vmem:[%s2834_s3 + $0x328] sm:$0xff]  ;;  %v2484_v13 = vld [vmem:[%s2834_s3 + $0x3a0] sm:$0xff] }
  0x49   : > { %1477 = vmatpush.bf16.msra.mxu2 %v2385_v28  ;;  %v2462_v28 = vld [vmem:[%s2834_s3 + $0x2f0] sm:$0xff]  ;;  %v2493_v10 = vld [vmem:[%s2834_s3 + $0x3e8] sm:$0xff]  ;;  %v2492_v14 = vld [vmem:[%s2834_s3 + $0x3e0] sm:$0xff] }
  0x4a   : > { %1490 = vmatpush.bf16.msra.mxu3 %v2393_v29  ;;  %v2437_v29 = vld [vmem:[%s2834_s3 + $0x228] sm:$0xff]  ;;  %v2442_v42 = vld [vmem:[%s2834_s3 + $0x250] sm:$0xff] }
  0x4b   : > { %1452 = vmatpush.bf16.msra.mxu0 %v2368_v32  ;;  %v2461_v32 = vld [vmem:[%s2834_s3 + $0x2e8] sm:$0xff]  ;;  %v2494_v6 = vld [vmem:[%s2834_s3 + $0x3f0] sm:$0xff] }
  0x4c   : > { %1465 = vmatpush.bf16.msra.mxu1 %v2376_v33  ;;  %v2436_v33 = vld [vmem:[%s2834_s3 + $0x220] sm:$0xff]  ;;  %v2466_v19 = vld [vmem:[%s2834_s3 + $0x310] sm:$0xff] }
  0x4d   : > { %1478 = vmatpush.bf16.msra.mxu2 %v2384_v35  ;;  %v2452_v35 = vld [vmem:[%s2834_s3 + $0x2a0] sm:$0xff] }
  0x4e   : > { %1491 = vmatpush.bf16.msra.mxu3 %v2392_v40  ;;  %1453 = vmatmul.bf16.vlgmr.msra.gmra.mxu0 %v545_v41  ;;  %v2459_v40 = vld [vmem:[%s2834_s3 + $0x2d8] sm:$0xff]  ;;  %v2434_v41 = vld [vmem:[%s2834_s3 + $0x210] sm:$0xff] }
  0x4f   : > { %1497 = vmatpush.bf16.msrb.mxu0 %v2407_v36  ;;  %1466 = vmatmul.bf16.vlgmr.msra.gmra.mxu1 %v546_v46  ;;  %v2460_v36 = vld [vmem:[%s2834_s3 + $0x2e0] sm:$0xff]  ;;  %v2441_v46 = vld [vmem:[%s2834_s3 + $0x248] sm:$0xff] }
  0x50   : > { %1510 = vmatpush.bf16.msrb.mxu1 %v2415_v38  ;;  %1479 = vmatmul.bf16.vlgmr.msra.gmra.mxu2 %v547_v44  ;;  %v2443_v38 = vld [vmem:[%s2834_s3 + $0x258] sm:$0xff]  ;;  %v2458_v44 = vld [vmem:[%s2834_s3 + $0x2d0] sm:$0xff] }
  0x51   : > { %1523 = vmatpush.bf16.msrb.mxu2 %v2423_v39  ;;  %1492 = vmatmul.bf16.vlgmr.msra.gmra.mxu3 %v548_v49  ;;  %v2451_v39 = vld [vmem:[%s2834_s3 + $0x298] sm:$0xff] }
  0x52   : > { %1536 = vmatpush.bf16.msrb.mxu3 %v2431_v43  ;;  %v2450_v43 = vld [vmem:[%s2834_s3 + $0x290] sm:$0xff]  ;;  %v226_v49 = vld [vmem:[%s2828_s29 + $0x28] sm:$0xff] }
  0x53   : > { %1498 = vmatpush.bf16.msrb.mxu0 %v2406_v45  ;;  %v2433_v45 = vld [vmem:[%s2834_s3 + $0x208] sm:$0xff] }
  0x54   : > { %1511 = vmatpush.bf16.msrb.mxu1 %v2414_v47  ;;  %v225_v47 = vld [vmem:[%s2828_s29 + $0x20] sm:$0xff] }
  0x55   : > { %1524 = vmatpush.bf16.msrb.mxu2 %v2422_v48  ;;  %v2449_v48 = vld [vmem:[%s2834_s3 + $0x288] sm:$0xff] }
  0x56   : > { %1537 = vmatpush.bf16.msrb.mxu3 %v2430_v50  ;;  %v2457_v50 = vld [vmem:[%s2834_s3 + $0x2c8] sm:$0xff] }
  0x57   : > { %1499 = vmatpush.bf16.msrb.mxu0 %v2405_v51  ;;  %v535_v51 = vunpack.c.l.b16 %v225_v47 }
  0x58   : > { %1512 = vmatpush.bf16.msrb.mxu1 %v2413_v52  ;;  %v2432_v52 = vld [vmem:[%s2834_s3 + $0x200] sm:$0xff] }
  0x59   : > { %1525 = vmatpush.bf16.msrb.mxu2 %v2421_v53  ;;  %v2440_v53 = vld [vmem:[%s2834_s3 + $0x240] sm:$0xff] }
  0x5a   : > { %1538 = vmatpush.bf16.msrb.mxu3 %v2429_v54  ;;  %v537_v54 = vunpack.c.l.b16 %v226_v49 }
  0x5b   : > { %1500 = vmatpush.bf16.msrb.mxu0 %v2404_v55  ;;  %v2448_v55 = vld [vmem:[%s2834_s3 + $0x280] sm:$0xff] }
  0x5c   : > { %1513 = vmatpush.bf16.msrb.mxu1 %v2412_v56  ;;  %v2471_v56 = vld [vmem:[%s2834_s3 + $0x338] sm:$0xff] }
  0x5d   : > { %1526 = vmatpush.bf16.msrb.mxu2 %v2420_v57  ;;  %v536_v57 = vunpack.c.h.b16 %v225_v47  ;;  %v2500_v47 = vld [vmem:[%s2834_s3 + $0x420] sm:$0xff] }
  0x5e   : > { %1539 = vmatpush.bf16.msrb.mxu3 %v2428_v58  ;;  %v2479_v58 = vld [vmem:[%s2834_s3 + $0x378] sm:$0xff] }
  0x5f   : > { %1501 = vmatpush.bf16.msrb.mxu0 %v2403_v59  ;;  %v2487_v59 = vld [vmem:[%s2834_s3 + $0x3b8] sm:$0xff] }
  0x60   : > { %1514 = vmatpush.bf16.msrb.mxu1 %v2411_v60  ;;  %v538_v60 = vunpack.c.h.b16 %v226_v49  ;;  %v2499_v49 = vld [vmem:[%s2834_s3 + $0x418] sm:$0xff] }
  0x61   : > { %1527 = vmatpush.bf16.msrb.mxu2 %v2419_v61  ;;  %v2456_v61 = vld [vmem:[%s2834_s3 + $0x2c0] sm:$0xff] }
  0x62   : > { %1540 = vmatpush.bf16.msrb.mxu3 %v2427_v62  ;;  %v553_v62 = vpack.c.b16 %v535_v51, %v535_v51  ;;  %v2498_v51 = vld [vmem:[%s2834_s3 + $0x410] sm:$0xff] }
  0x63   : > { %1502 = vmatpush.bf16.msrb.mxu0 %v2402_v63  ;;  %v555_v63 = vpack.c.b16 %v537_v54, %v537_v54  ;;  %v229_v54 = vld [vmem:[%s2828_s29 + $0x40] sm:$0xff] }
  0x64   : > { %1515 = vmatpush.bf16.msrb.mxu1 %v2410_v0  ;;  %v2495_v0 = vld [vmem:[%s2834_s3 + $0x3f8] sm:$0xff] }
  0x65   : > { %1528 = vmatpush.bf16.msrb.mxu2 %v2418_v1  ;;  %v554_v1 = vpack.c.b16 %v536_v57, %v536_v57  ;;  %v2496_v57 = vld [vmem:[%s2834_s3 + $0x400] sm:$0xff] }
  0x66   : > { %1541 = vmatpush.bf16.msrb.mxu3 %v2426_v2  ;;  %v2470_v2 = vld [vmem:[%s2834_s3 + $0x330] sm:$0xff] }
  0x67   : > { %1503 = vmatpush.bf16.msrb.mxu0 %v2401_v3  ;;  %v556_v3 = vpack.c.b16 %v538_v60, %v538_v60 }
  0x68   : > { %1516 = vmatpush.bf16.msrb.mxu1 %v2409_v4  ;;  %v2478_v4 = vld [vmem:[%s2834_s3 + $0x370] sm:$0xff] }
  0x69   : > { %1529 = vmatpush.bf16.msrb.mxu2 %v2417_v5  ;;  %v2486_v5 = vld [vmem:[%s2834_s3 + $0x3b0] sm:$0xff] }
  0x6a   : > { %1542 = vmatpush.bf16.msrb.mxu3 %v2425_v8  ;;  %v2477_v8 = vld [vmem:[%s2834_s3 + $0x368] sm:$0xff] }
  0x6b   : > { %1504 = vmatpush.bf16.msrb.mxu0 %v2400_v9  ;;  %v2485_v9 = vld [vmem:[%s2834_s3 + $0x3a8] sm:$0xff] }
  0x6c   : > { %1517 = vmatpush.bf16.msrb.mxu1 %v2408_v11  ;;  %v2468_v11 = vld [vmem:[%s2834_s3 + $0x320] sm:$0xff] }
  0x6d   : > { %1530 = vmatpush.bf16.msrb.mxu2 %v2416_v12  ;;  %v2476_v12 = vld [vmem:[%s2834_s3 + $0x360] sm:$0xff] }
  0x6e   : > { %1543 = vmatpush.bf16.msrb.mxu3 %v2424_v18  ;;  %1505 = vmatmul.bf16.vlgmr.msrb.gmra.mxu0 %v549_v22  ;;  %v2491_v18 = vld [vmem:[%s2834_s3 + $0x3d8] sm:$0xff]  ;;  %v2490_v22 = vld [vmem:[%s2834_s3 + $0x3d0] sm:$0xff] }
  0x6f   : > { %1549 = vmatpush.bf16.msra.mxu0 %v2439_v15  ;;  %1518 = vmatmul.bf16.vlgmr.msrb.gmra.mxu1 %v550_v23  ;;  %v2467_v15 = vld [vmem:[%s2834_s3 + $0x318] sm:$0xff]  ;;  %v2465_v23 = vld [vmem:[%s2834_s3 + $0x308] sm:$0xff] }
  0x70   : > { %1562 = vmatpush.bf16.msra.mxu1 %v2447_v16  ;;  %1531 = vmatmul.bf16.vlgmr.msrb.gmra.mxu2 %v551_v21  ;;  %v2475_v16 = vld [vmem:[%s2834_s3 + $0x358] sm:$0xff]  ;;  %v2482_v21 = vld [vmem:[%s2834_s3 + $0x390] sm:$0xff] }
  0x71   : > { %1575 = vmatpush.bf16.msra.mxu2 %v2455_v17  ;;  %1544 = vmatmul.bf16.vlgmr.msrb.gmra.mxu3 %v552_v27  ;;  %v2483_v17 = vld [vmem:[%s2834_s3 + $0x398] sm:$0xff]  ;;  %v228_v27 = vld [vmem:[%s2828_s29 + $0x38] sm:$0xff] }
  0x72   : > { %1588 = vmatpush.bf16.msra.mxu3 %v2463_v20  ;;  %v2474_v20 = vld [vmem:[%s2834_s3 + $0x350] sm:$0xff] }
  0x73   : > { %1550 = vmatpush.bf16.msra.mxu0 %v2438_v24  ;;  %v227_v24 = vld [vmem:[%s2828_s29 + $0x30] sm:$0xff] }
  0x74   : > { %1563 = vmatpush.bf16.msra.mxu1 %v2446_v25  ;;  %v2473_v25 = vld [vmem:[%s2834_s3 + $0x348] sm:$0xff] }
  0x75   : > { %1576 = vmatpush.bf16.msra.mxu2 %v2454_v26  ;;  %v2481_v26 = vld [vmem:[%s2834_s3 + $0x388] sm:$0xff] }
  0x76   : > { %1589 = vmatpush.bf16.msra.mxu3 %v2462_v28  ;;  %v2489_v28 = vld [vmem:[%s2834_s3 + $0x3c8] sm:$0xff] }
  0x77   : > { %1551 = vmatpush.bf16.msra.mxu0 %v2437_v29  ;;  %v539_v29 = vunpack.c.l.b16 %v227_v24 }
  0x78   : > { %1564 = vmatpush.bf16.msra.mxu1 %v2445_v30  ;;  %v2464_v30 = vld [vmem:[%s2834_s3 + $0x300] sm:$0xff] }
  0x79   : > { %1577 = vmatpush.bf16.msra.mxu2 %v2453_v31  ;;  %v540_v31 = vunpack.c.h.b16 %v227_v24 }
  0x7a   : > { %1590 = vmatpush.bf16.msra.mxu3 %v2461_v32  ;;  %v2472_v32 = vld [vmem:[%s2834_s3 + $0x340] sm:$0xff] }
  0x7b   : > { %1552 = vmatpush.bf16.msra.mxu0 %v2436_v33  ;;  %v2503_v33 = vld [vmem:[%s2834_s3 + $0x438] sm:$0xff] }
  0x7c   : > { %1565 = vmatpush.bf16.msra.mxu1 %v2444_v34  ;;  %v541_v34 = vunpack.c.l.b16 %v228_v27 }
  0x7d   : > { %1578 = vmatpush.bf16.msra.mxu2 %v2452_v35  ;;  %v2480_v35 = vld [vmem:[%s2834_s3 + $0x380] sm:$0xff] }
  0x7e   : > { %1591 = vmatpush.bf16.msra.mxu3 %v2460_v36  ;;  %v2511_v36 = vld [vmem:[%s2834_s3 + $0x478] sm:$0xff] }
  0x7f   : > { %1553 = vmatpush.bf16.msra.mxu0 %v2435_v37  ;;  %v542_v37 = vunpack.c.h.b16 %v228_v27 }
  0x80   : > { %1566 = vmatpush.bf16.msra.mxu1 %v2443_v38  ;;  %v2488_v38 = vld [vmem:[%s2834_s3 + $0x3c0] sm:$0xff] }
  0x81   : > { %1579 = vmatpush.bf16.msra.mxu2 %v2451_v39  ;;  %v557_v39 = vpack.c.b16 %v539_v29, %v539_v29 }
  0x82   : > { %1592 = vmatpush.bf16.msra.mxu3 %v2459_v40  ;;  %v558_v40 = vpack.c.b16 %v540_v31, %v540_v31 }
  0x83   : > { %1554 = vmatpush.bf16.msra.mxu0 %v2434_v41  ;;  %v559_v41 = vpack.c.b16 %v541_v34, %v541_v34 }
  0x84   : > { %1567 = vmatpush.bf16.msra.mxu1 %v2442_v42  ;;  %v2502_v42 = vld [vmem:[%s2834_s3 + $0x430] sm:$0xff] }
  0x85   : > { %1580 = vmatpush.bf16.msra.mxu2 %v2450_v43  ;;  %v560_v43 = vpack.c.b16 %v542_v37, %v542_v37 }
  0x86   : > { %1593 = vmatpush.bf16.msra.mxu3 %v2458_v44  ;;  %v2510_v44 = vld [vmem:[%s2834_s3 + $0x470] sm:$0xff] }
  0x87   : > { %1555 = vmatpush.bf16.msra.mxu0 %v2433_v45  ;;  %v2501_v45 = vld [vmem:[%s2834_s3 + $0x428] sm:$0xff] }
  0x88   : > { %1568 = vmatpush.bf16.msra.mxu1 %v2441_v46  ;;  %v2509_v46 = vld [vmem:[%s2834_s3 + $0x468] sm:$0xff] }
  0x89   : > { %1581 = vmatpush.bf16.msra.mxu2 %v2449_v48  ;;  %v2508_v48 = vld [vmem:[%s2834_s3 + $0x460] sm:$0xff] }
  0x8a   : > { %1594 = vmatpush.bf16.msra.mxu3 %v2457_v50  ;;  %v2507_v50 = vld [vmem:[%s2834_s3 + $0x458] sm:$0xff] }
  0x8b   : > { %1556 = vmatpush.bf16.msra.mxu0 %v2432_v52  ;;  %v2506_v52 = vld [vmem:[%s2834_s3 + $0x450] sm:$0xff] }
  0x8c   : > { %1569 = vmatpush.bf16.msra.mxu1 %v2440_v53  ;;  %v2497_v53 = vld [vmem:[%s2834_s3 + $0x408] sm:$0xff] }
  0x8d   : > { %1582 = vmatpush.bf16.msra.mxu2 %v2448_v55  ;;  %v2505_v55 = vld [vmem:[%s2834_s3 + $0x448] sm:$0xff] }
  0x8e   : > { %1595 = vmatpush.bf16.msra.mxu3 %v2456_v61  ;;  %1557 = vmatmul.bf16.vlgmr.msra.gmra.mxu0 %v553_v62 }
  0x8f   : > { %1601 = vmatpush.bf16.msrb.mxu0 %v2471_v56  ;;  %1570 = vmatmul.bf16.vlgmr.msra.gmra.mxu1 %v554_v1  ;;  %v543_v56 = vunpack.c.l.b16 %v229_v54 }
  0x90   : > { %1614 = vmatpush.bf16.msrb.mxu1 %v2479_v58  ;;  %1583 = vmatmul.bf16.vlgmr.msra.gmra.mxu2 %v555_v63  ;;  %v544_v58 = vunpack.c.h.b16 %v229_v54 }
  0x91   : > { %1627 = vmatpush.bf16.msrb.mxu2 %v2487_v59  ;;  %1596 = vmatmul.bf16.vlgmr.msra.gmra.mxu3 %v556_v3  ;;  %v2504_v59 = vld [vmem:[%s2834_s3 + $0x440] sm:$0xff]  ;;  %v561_v60 = vpack.c.b16 %v543_v56, %v543_v56 }
  0x92   : > { %1640 = vmatpush.bf16.msrb.mxu3 %v2495_v0  ;;  %v562_v61 = vpack.c.b16 %v544_v58, %v544_v58 }
  0x93   : > { %1602 = vmatpush.bf16.msrb.mxu0 %v2470_v2 }
  0x94   : > { %1615 = vmatpush.bf16.msrb.mxu1 %v2478_v4 }
  0x95   : > { %1628 = vmatpush.bf16.msrb.mxu2 %v2486_v5 }
  0x96   : > { %1641 = vmatpush.bf16.msrb.mxu3 %v2494_v6 }
  0x97   : > { %1603 = vmatpush.bf16.msrb.mxu0 %v2469_v7 }
  0x98   : > { %1616 = vmatpush.bf16.msrb.mxu1 %v2477_v8 }
  0x99   : > { %1629 = vmatpush.bf16.msrb.mxu2 %v2485_v9 }
  0x9a   : > { %1642 = vmatpush.bf16.msrb.mxu3 %v2493_v10 }
  0x9b   : > { %1604 = vmatpush.bf16.msrb.mxu0 %v2468_v11 }
  0x9c   : > { %1617 = vmatpush.bf16.msrb.mxu1 %v2476_v12 }
  0x9d   : > { %1630 = vmatpush.bf16.msrb.mxu2 %v2484_v13 }
  0x9e   : > { %1643 = vmatpush.bf16.msrb.mxu3 %v2492_v14 }
  0x9f   : > { %1605 = vmatpush.bf16.msrb.mxu0 %v2467_v15 }
  0xa0   : > { %1618 = vmatpush.bf16.msrb.mxu1 %v2475_v16 }
  0xa1   : > { %1631 = vmatpush.bf16.msrb.mxu2 %v2483_v17 }
  0xa2   : > { %1644 = vmatpush.bf16.msrb.mxu3 %v2491_v18 }
  0xa3   : > { %1606 = vmatpush.bf16.msrb.mxu0 %v2466_v19 }
  0xa4   : > { %1619 = vmatpush.bf16.msrb.mxu1 %v2474_v20 }
  0xa5   : > { %1632 = vmatpush.bf16.msrb.mxu2 %v2482_v21 }
  0xa6   : > { %1645 = vmatpush.bf16.msrb.mxu3 %v2490_v22 }
  0xa7   : > { %1607 = vmatpush.bf16.msrb.mxu0 %v2465_v23 }
  0xa8   : > { %1620 = vmatpush.bf16.msrb.mxu1 %v2473_v25 }
  0xa9   : > { %1633 = vmatpush.bf16.msrb.mxu2 %v2481_v26 }
  0xaa   : > { %1646 = vmatpush.bf16.msrb.mxu3 %v2489_v28 }
  0xab   : > { %1608 = vmatpush.bf16.msrb.mxu0 %v2464_v30 }
  0xac   : > { %1621 = vmatpush.bf16.msrb.mxu1 %v2472_v32 }
  0xad   : > { %1634 = vmatpush.bf16.msrb.mxu2 %v2480_v35 }
  0xae   : > { %1647 = vmatpush.bf16.msrb.mxu3 %v2488_v38  ;;  %1609 = vmatmul.bf16.vlgmr.msrb.gmra.mxu0 %v557_v39 }
  0xaf   : > { %1653 = vmatpush.bf16.msra.mxu0 %v2503_v33  ;;  %1622 = vmatmul.bf16.vlgmr.msrb.gmra.mxu1 %v558_v40 }
  0xb0   : > { %1666 = vmatpush.bf16.msra.mxu1 %v2511_v36  ;;  %1635 = vmatmul.bf16.vlgmr.msrb.gmra.mxu2 %v559_v41 }
  0xb1   : > { %1648 = vmatmul.bf16.vlgmr.msrb.gmra.mxu3 %v560_v43 }
  0xb3   : > { %1654 = vmatpush.bf16.msra.mxu0 %v2502_v42 }
  0xb4   : > { %1667 = vmatpush.bf16.msra.mxu1 %v2510_v44 }
  0xb7   : > { %1655 = vmatpush.bf16.msra.mxu0 %v2501_v45 }
  0xb8   : > { %1668 = vmatpush.bf16.msra.mxu1 %v2509_v46 }
  0xbb   : > { %1656 = vmatpush.bf16.msra.mxu0 %v2500_v47 }
  0xbc   : > { %1669 = vmatpush.bf16.msra.mxu1 %v2508_v48  ;;  %v220_v48 = vld [vmem:[#allocation7] sm:$0xff] }
  0xbf   : > { %1657 = vmatpush.bf16.msra.mxu0 %v2499_v49 }
  0xc0   : > { %1670 = vmatpush.bf16.msra.mxu1 %v2507_v50 }
  0xc3   : > { %1658 = vmatpush.bf16.msra.mxu0 %v2498_v51 }
  0xc4   : > { %1671 = vmatpush.bf16.msra.mxu1 %v2506_v52 }
  0xc7   : > { %1659 = vmatpush.bf16.msra.mxu0 %v2497_v53 }
  0xc8   : > { %1672 = vmatpush.bf16.msra.mxu1 %v2505_v55 }
  0xcb   : > { %1660 = vmatpush.bf16.msra.mxu0 %v2496_v57  ;;  %v1454_v62 = vpop.f32.mrf.mxu0 }
  0xcc   : > { %1673 = vmatpush.bf16.msra.mxu1 %v2504_v59  ;;  %v1467_v63 = vpop.f32.mrf.mxu1 }
  0xcd   : > { %v1468_v0 = vadd.f32 %v1467_v63, %v1454_v62 }
  0xce   : > { %1661 = vmatmul.bf16.vlgmr.msra.gmra.mxu0 %v561_v60 }
  0xcf   : > { %1674 = vmatmul.bf16.vlgmr.msra.gmra.mxu1 %v562_v61 }
  0xd3   : > { %v1480_v1 = vpop.f32.mrf.mxu2  ;;  %v1456_v3 = vpop.f32.mrf.mxu0 }
  0xd4   : > { %v1481_v2 = vadd.f32 %v1480_v1, %v1468_v0  ;;  %v1493_v4 = vpop.f32.mrf.mxu3  ;;  %v1469_v5 = vpop.f32.mrf.mxu1 }
  0xd6   : > { %v1494_v6 = vadd.f32 %v1493_v4, %v1481_v2 }
  0xdb   : > { %v1482_v7 = vpop.f32.mrf.mxu2 }
  0xdc   : > { %v1495_v8 = vpop.f32.mrf.mxu3 }
  0xeb   : > { %v1506_v9 = vpop.f32.mrf.mxu0 }
  0xec   : > { %v1519_v10 = vpop.f32.mrf.mxu1  ;;  %v1507_v25 = vadd.f32 %v1506_v9, %v1494_v6 }
  0xee   : > { %v1520_v26 = vadd.f32 %v1519_v10, %v1507_v25 }
  0xf3   : > { %v1532_v11 = vpop.f32.mrf.mxu2  ;;  %v1508_v13 = vpop.f32.mrf.mxu0 }
  0xf4   : > { %v1545_v12 = vpop.f32.mrf.mxu3  ;;  %v1521_v14 = vpop.f32.mrf.mxu1  ;;  %v1533_v27 = vadd.f32 %v1532_v11, %v1520_v26 }
  0xf6   : > { %v1546_v30 = vadd.f32 %v1545_v12, %v1533_v27 }
  0xfb   : > { %v1534_v15 = vpop.f32.mrf.mxu2 }
  0xfc   : > { %v1547_v16 = vpop.f32.mrf.mxu3 }
 0x10b   : > { %v1558_v17 = vpop.f32.mrf.mxu0 }
 0x10c   : > { %v1571_v18 = vpop.f32.mrf.mxu1  ;;  %v1559_v31 = vadd.f32 %v1558_v17, %v1546_v30 }
 0x10e   : > { %v1572_v36 = vadd.f32 %v1571_v18, %v1559_v31 }
 0x113   : > { %v1584_v19 = vpop.f32.mrf.mxu2  ;;  %v1560_v20 = vpop.f32.mrf.mxu0 }
 0x114   : > { %v1597_v21 = vpop.f32.mrf.mxu3  ;;  %v1573_v22 = vpop.f32.mrf.mxu1  ;;  %v1585_v37 = vadd.f32 %v1584_v19, %v1572_v36 }
 0x116   : > { %v1598_v38 = vadd.f32 %v1597_v21, %v1585_v37 }
 0x11b   : > { %v1586_v23 = vpop.f32.mrf.mxu2 }
 0x11c   : > { %v1599_v24 = vpop.f32.mrf.mxu3 }
 0x12b   : > { %v1610_v28 = vpop.f32.mrf.mxu0 }
 0x12c   : > { %v1623_v29 = vpop.f32.mrf.mxu1  ;;  %v1611_v41 = vadd.f32 %v1610_v28, %v1598_v38 }
 0x12e   : > { %v1624_v42 = vadd.f32 %v1623_v29, %v1611_v41 }
 0x133   : > { %v1636_v32 = vpop.f32.mrf.mxu2  ;;  %v1612_v33 = vpop.f32.mrf.mxu0 }
 0x134   : > { %v1649_v34 = vpop.f32.mrf.mxu3  ;;  %v1625_v35 = vpop.f32.mrf.mxu1  ;;  %v1637_v43 = vadd.f32 %v1636_v32, %v1624_v42 }
 0x136   : > { %v1650_v44 = vadd.f32 %v1649_v34, %v1637_v43 }
 0x13b   : > { %v1638_v39 = vpop.f32.mrf.mxu2 }
 0x13c   : > { %v1651_v40 = vpop.f32.mrf.mxu3 }
 0x14b   : > { %v1662_v45 = vpop.f32.mrf.mxu0 }
 0x14c   : > { %v1663_v46 = vadd.f32 %v1662_v45, %v1650_v44  ;;  %v1675_v47 = vpop.f32.mrf.mxu1 }
 0x14e   : > { %v1676_v49 = vadd.f32 %v1675_v47, %v1663_v46 }
 0x150   : > { %v1679_v50 = vadd.f32 %v1676_v49, %v220_v48 }
 0x152   : > { %1680 = vst [vmem:[#allocation7] sm:$0xff] %v1679_v50 }
 0x153   : > { %v1664_v51 = vpop.f32.mrf.mxu0  ;;  %2521 = dma.vmem_to_hbm [thread:$0]  (%p2532_p0), %s1690_s19, 128, %s1692_s5, [#allocation4]  }
 0x154   : > { %v1677_v52 = vpop.f32.mrf.mxu1 }
 0x155   : > { %2707 = dma.done.wait (%p2532_p0), [#allocation4], 128  }
 0x156   : > { %2709 = vsyncadd (%p2532_p0), [#allocation4], 4294967168 }
 0x157 PF: > { %s19_s14 = sadd.s32 1, %s2732_s14   ;;  %s3022_s9 = smov %s2716_s10 }
 0x158   : > { %p16_p1 = scmp.ge.s32.totalorder %s19_s14, 8   ;;  %s3023_s10 = smov %s2720_s11 }
 0x159   : > { %s3024_s11 = smov %s2800_s20  ;;  %s3025_s12 = smov %s2728_s13 }
 0x15a   : > { %s3026_s13 = smov %s3028_s16  ;;  %18 = sbr.rel (!%p16_p1) target bundleno = 7 (0x7), region = 83 }
 0x15f   :  { %1705 = vsyncpa [#allocation3], 1 }
 0x160   :  { %1707 = vsyncpa [#allocation3 + $0x1], 1 }
 0x161   :  { %1708 = vsyncpa [#allocation6], 1 }
 0x162   :  { %1710 = vsyncpa [#allocation6 + $0x1], 1 }
 0x163   :  { %1711 = vsyncpa [#allocation4], 1 }
 0x164   :  { %1713 = vsyncpa [#allocation4 + $0x1], 1 }

</bundles_post_ra>
